<compile_context>
chip_gen: v5e
topology: v5e:2x2
jax: 0.10.0
libtpu: 0.0.40
codegen_flags: <defaults>
</compile_context>

<pallas_src>
import jax
import jax.numpy as jnp
from jax.experimental import pallas as pl
from jax.experimental.pallas import tpu as pltpu


# ----------------------------------------------------------------------------
# VMEM budgeting / tile picking
# ----------------------------------------------------------------------------
def _vmem_capacity_bytes():
    try:
        info = pltpu.get_tpu_info()
        for name in ("vmem_capacity_bytes", "vmem_size_bytes", "vmem_bytes"):
            v = getattr(info, name, None)
            if v:
                return int(v)
    except Exception:
        pass
    return 64 * 1024 * 1024            # conservative default (v7x per-TC VMEM)


def _vmem_estimate(th, w, cin, cout):
    in_blk = th * w * cin * 2                       # bf16 main block
    halo = 2 * w * cin * 2                          # two 1-row halo blocks
    w_blk = 9 * cin * cout * 2                      # folded weights
    out_blk = (th // 2) * (w // 2) * 4 * cout * 4   # f32 fused-unshuffle output
    scratch = 9 * (th + 2) * w * cin * 2            # x_full + shifts + x_cat + slabs
    scratch += 3 * th * w * cout * 4                # acc value + VMEM scratch + gather
    return 2 * (in_blk + halo) + 2 * w_blk + 2 * out_blk + scratch


def _pick_tile_h(b, h, w, cin, cout, budget):
    """Largest even divisor of H fitting the VMEM budget; prefer >=4 grid steps."""
    cands = sorted((d for d in range(2, h + 1, 2) if h % d == 0), reverse=True)
    if not cands:
        return h, _vmem_estimate(h, w, cin, cout)
    fitting = [d for d in cands if _vmem_estimate(d, w, cin, cout) <= budget]
    if not fitting:
        fitting = [cands[-1]]          # smallest even divisor (= 2)
    for d in fitting:                  # descending: biggest tile that still gives
        if b * (h // d) >= 4:          # enough steps for 2 v7x TCs + pipeline depth
            return d, _vmem_estimate(d, w, cin, cout)
    d = fitting[0]
    return d, _vmem_estimate(d, w, cin, cout)


# ----------------------------------------------------------------------------
# Pallas kernel: 3x3 conv (halos read via clamped specs, W padding in-kernel)
# with PixelUnshuffle(2) fused into the store.
# ----------------------------------------------------------------------------
def _conv3x3_unshuffle_kernel(top_ref, x_ref, bot_ref, w_ref, o_ref, acc_ref):
    # top_ref/bot_ref: (1, 1, W, Cin)  bf16 halo rows (clamped; zeroed at edges)
    # x_ref:           (1, TH, W, Cin) bf16 main rows of the tile
    # w_ref:           (3, 3*Cin, Cout) bf16, index (kh, kw*Cin + ci, co)
    # o_ref:           (1, TH//2, W//2, 4*Cout) fused-unshuffle output,
    #                  channel index = (i*2 + j)*Cout + co  (i=row, j=col parity)
    # acc_ref:         (TH, W, Cout) f32 VMEM scratch holding the conv tile
    t = pl.program_id(1)
    nt = pl.num_programs(1)

    x_main = x_ref[0]                                   # (TH, W, Cin)
    th, wdt, cin = x_main.shape
    cout = w_ref.shape[-1]

    top = top_ref[0]                                    # (1, W, Cin)
    bot = bot_ref[0]
    top = jnp.where(t > 0, top, jnp.zeros_like(top))            # zero pad at image top
    bot = jnp.where(t < nt - 1, bot, jnp.zeros_like(bot))       # zero pad at image bottom
    x_full = jnp.concatenate([top, x_main, bot], axis=0)        # (TH+2, W, Cin)

    # Column shifts: zero padding in W handled here (no padded copy in HBM).
    zc = jnp.zeros((th + 2, 1, cin), x_full.dtype)
    x_l = jnp.concatenate([zc, x_full[:, :wdt - 1, :]], axis=1)     # x[.., w-1, :]
    x_r = jnp.concatenate([x_full[:, 1:, :], zc], axis=1)           # x[.., w+1, :]
    x_cat = jnp.concatenate([x_l, x_full, x_r], axis=-1)            # (TH+2, W, 3*Cin)

    # Three MXU matmuls with K = 3*Cin (taps folded into the contraction).
    acc = jnp.zeros((th * wdt, cout), jnp.float32)
    for kh in range(3):
        slab = x_cat[kh:kh + th].reshape(th * wdt, 3 * cin)
        acc = acc + jnp.dot(slab, w_ref[kh], preferred_element_type=jnp.float32)
    acc_ref[...] = acc.reshape(th, wdt, cout)

    # Fused PixelUnshuffle(2): gather the four spatial parities with strided
    # loads and store them channel-contiguous (output lane width = 4*Cout).
    parts = []
    for i in range(2):
        for j in range(2):
            parts.append(acc_ref[pl.ds(i, th // 2, stride=2),
                                 pl.ds(j, wdt // 2, stride=2), :])
    out = jnp.concatenate(parts, axis=-1)               # (TH//2, W//2, 4*Cout)
    o_ref[...] = out[None].astype(o_ref.dtype)


# ----------------------------------------------------------------------------
# Downsample forward: NCHW in / NCHW out, like the PyTorch module.
# ----------------------------------------------------------------------------
def downsample_forward(x_nchw, w_oihw, tile_h=None, out_dtype=jnp.float32):
    """Conv2d(n_feat, n_feat//2, 3, 1, 1, bias=False) + PixelUnshuffle(2)."""
    b, cin, h, wd = x_nchw.shape
    cout = w_oihw.shape[0]
    assert h % 2 == 0 and wd % 2 == 0, "PixelUnshuffle(2) needs even H, W"

    # One fused XLA pass: NCHW f32 -> NHWC bf16 (transpose + downcast).
    xb = jnp.transpose(x_nchw, (0, 2, 3, 1)).astype(jnp.bfloat16)
    # (Cout, Cin, 3, 3) -> (kh, kw, Cin, Cout) -> (3, 3*Cin, Cout), bf16.
    wk = jnp.transpose(w_oihw, (2, 3, 1, 0)).reshape(3, 3 * cin, cout)
    wk = wk.astype(jnp.bfloat16)

    vmem_cap = _vmem_capacity_bytes()
    budget = min(int(vmem_cap * 0.6), 48 * 1024 * 1024)
    if tile_h is None:
        th, est = _pick_tile_h(b, h, wd, cin, cout, budget)
    else:
        th = int(tile_h)
        est = _vmem_estimate(th, wd, cin, cout)
    assert th % 2 == 0 and h % th == 0, (h, th)
    nt = h // th

    vmem_limit = int(min(vmem_cap * 3 // 4,
                         max(32 * 1024 * 1024, int(1.5 * est))))

    cost = pl.CostEstimate(
        flops=2 * b * h * wd * 9 * cin * cout,
        transcendentals=0,
        bytes_accessed=int(xb.size * 2 + wk.size * 2 + b * h * wd * cout * 4),
    )

    def top_map(bi, ti):
        return (bi, jnp.maximum(ti * th - 1, 0), 0, 0)       # 1-row halo above

    def main_map(bi, ti):
        return (bi, ti, 0, 0)

    def bot_map(bi, ti):
        return (bi, jnp.minimum(ti * th + th, h - 1), 0, 0)  # 1-row halo below

    y = pl.pallas_call(
        _conv3x3_unshuffle_kernel,
        out_shape=jax.ShapeDtypeStruct((b, h // 2, wd // 2, 4 * cout), out_dtype),
        grid=(b, nt),
        in_specs=[
            pl.BlockSpec((1, 1, wd, cin), top_map),
            pl.BlockSpec((1, th, wd, cin), main_map),
            pl.BlockSpec((1, 1, wd, cin), bot_map),
            pl.BlockSpec((3, 3 * cin, cout), lambda bi, ti: (0, 0, 0)),
        ],
        out_specs=pl.BlockSpec((1, th // 2, wd // 2, 4 * cout),
                               lambda bi, ti: (bi, ti, 0, 0)),
        scratch_shapes=[pltpu.VMEM((th, wd, cout), jnp.float32)],
        compiler_params=pltpu.CompilerParams(
            dimension_semantics=("parallel", "parallel"),
            vmem_limit_bytes=vmem_limit,
        ),
        cost_estimate=cost,
    )(xb, xb, xb, wk)

    # Kernel emits channels as (parity, c) with parity = i*2 + j.  One XLA
    # permute on the half-resolution output reorders to PixelUnshuffle's
    # (c, i, j) ordering and goes NHWC -> NCHW.
    # TODO(synk): a weights-stationary (Cout x pixels) formulation could emit
    #             NCHW directly and drop this permute.
    y = y.reshape(b, h // 2, wd // 2, 4, cout)
    y = jnp.transpose(y, (0, 4, 3, 1, 2))
    return y.reshape(b, cout * 4, h // 2, wd // 2)


# ----------------------------------------------------------------------------
# Pure-JAX reference (mirrors the PyTorch module) for a sanity check.
# ----------------------------------------------------------------------------
def _reference(x_nchw, w_oihw):
    b, cin, h, wd = x_nchw.shape
    cout = w_oihw.shape[0]
    xp = jnp.pad(x_nchw, ((0, 0), (0, 0), (1, 1), (1, 1)))
    y = jnp.zeros((b, cout, h, wd), jnp.float32)
    for r in range(3):
        for s in range(3):
            y = y + jnp.einsum("bchw,oc->bohw",
                               xp[:, :, r:r + h, s:s + wd], w_oihw[:, :, r, s])
    y = y.reshape(b, cout, h // 2, 2, wd // 2, 2)
    y = jnp.transpose(y, (0, 1, 3, 5, 2, 4))
    return y.reshape(b, cout * 4, h // 2, wd // 2)


if __name__ == "__main__":
    key = jax.random.PRNGKey(0)
    k_x, k_w = jax.random.split(key)

    n_feat, batch, height, width = 16, 2, 16, 16
    x = jax.random.normal(k_x, (batch, n_feat, height, width), dtype=jnp.float32)
    w = 0.05 * jax.random.normal(k_w, (n_feat // 2, n_feat, 3, 3),
                                 dtype=jnp.float32)

    fwd = jax.jit(downsample_forward, static_argnames=("tile_h",))

    out = jax.block_until_ready(fwd(x, w))                   # auto tile (halo path)
    out_one = jax.block_until_ready(fwd(x, w, tile_h=16))    # single-tile path
    out_min = jax.block_until_ready(fwd(x, w, tile_h=2))     # smallest tile

    ref = _reference(x, w)

    assert out.shape == (batch, 2 * n_feat, height // 2, width // 2), out.shape
    assert jnp.all(jnp.isfinite(out)), "non-finite output"
    # bf16 operands / f32 accumulation -> loose tolerance vs the f32 reference.
    for o in (out, out_one, out_min):
        assert jnp.allclose(o, ref, rtol=2e-2, atol=2e-2), \
            float(jnp.max(jnp.abs(o - ref)))
    print("KERNEL_OK")
</pallas_src>

<mosaic_0001>
module attributes {stable_mosaic.version = 11 : i64} {
  func.func @_conv3x3_unshuffle_kernel(%arg0: i32, %arg1: i32, %arg2: memref<1x1x16x16xbf16, #tpu.memory_space<vmem>>, %arg3: memref<1x8x16x16xbf16, #tpu.memory_space<vmem>>, %arg4: memref<1x1x16x16xbf16, #tpu.memory_space<vmem>>, %arg5: memref<3x48x8xbf16, #tpu.memory_space<vmem>>, %arg6: memref<1x4x8x32xf32, #tpu.memory_space<vmem>>, %arg7: memref<8x16x8xf32, #tpu.memory_space<vmem>>) attributes {dimension_semantics = [#tpu.dimension_semantics<parallel>, #tpu.dimension_semantics<parallel>], iteration_bounds = array<i64: 2, 2>, scalar_prefetch = 0 : i64, scratch_operands = 1 : i64, tpu.core_type = #tpu.core_type<tc>, window_params = [{transform_indices = @transform_0, window_bounds = array<i64: 1, 1, 16, 16>}, {transform_indices = @transform_1, window_bounds = array<i64: 1, 8, 16, 16>}, {transform_indices = @transform_2, window_bounds = array<i64: 1, 1, 16, 16>}, {pipeline_mode = #tpu.pipeline_mode<synchronous>, transform_indices = @transform_3, window_bounds = array<i64: 3, 48, 8>}, {transform_indices = @transform_4, window_bounds = array<i64: 1, 4, 8, 32>}]} {
    %c0 = arith.constant 0 : index
    %c0_0 = arith.constant 0 : index
    %c0_1 = arith.constant 0 : index
    %c0_2 = arith.constant 0 : index
    %0 = vector.load %arg3[%c0, %c0_0, %c0_1, %c0_2] : memref<1x8x16x16xbf16, #tpu.memory_space<vmem>>, vector<1x8x16x16xbf16>
    %1 = vector.shape_cast %0 : vector<1x8x16x16xbf16> to vector<8x16x16xbf16>
    %c0_3 = arith.constant 0 : index
    %c0_4 = arith.constant 0 : index
    %c0_5 = arith.constant 0 : index
    %c0_6 = arith.constant 0 : index
    %2 = vector.load %arg2[%c0_3, %c0_4, %c0_5, %c0_6] : memref<1x1x16x16xbf16, #tpu.memory_space<vmem>>, vector<1x1x16x16xbf16>
    %3 = vector.shape_cast %2 : vector<1x1x16x16xbf16> to vector<1x16x16xbf16>
    %c0_7 = arith.constant 0 : index
    %c0_8 = arith.constant 0 : index
    %c0_9 = arith.constant 0 : index
    %c0_10 = arith.constant 0 : index
    %4 = vector.load %arg4[%c0_7, %c0_8, %c0_9, %c0_10] : memref<1x1x16x16xbf16, #tpu.memory_space<vmem>>, vector<1x1x16x16xbf16>
    %5 = vector.shape_cast %4 : vector<1x1x16x16xbf16> to vector<1x16x16xbf16>
    %c0_i32 = arith.constant 0 : i32
    %6 = arith.cmpi sgt, %arg1, %c0_i32 : i32
    %cst = arith.constant 0.000000e+00 : bf16
    %7 = vector.broadcast %cst : bf16 to vector<1x16x16xbf16>
    %8 = arith.select %6, %3, %7 : vector<1x16x16xbf16>
    %c1_i32 = arith.constant 1 : i32
    %9 = arith.cmpi slt, %arg1, %c1_i32 : i32
    %cst_11 = arith.constant 0.000000e+00 : bf16
    %10 = vector.broadcast %cst_11 : bf16 to vector<1x16x16xbf16>
    %11 = arith.select %9, %5, %10 : vector<1x16x16xbf16>
    %12 = tpu.concatenate %8, %1, %11 in 0 : vector<1x16x16xbf16>, vector<8x16x16xbf16>, vector<1x16x16xbf16> -> vector<10x16x16xbf16>
    %cst_12 = arith.constant 0.000000e+00 : bf16
    %13 = vector.broadcast %cst_12 : bf16 to vector<10x1x16xbf16>
    %14 = vector.extract_strided_slice %12 {offsets = [0, 0, 0], sizes = [10, 15, 16], strides = [1, 1, 1]} : vector<10x16x16xbf16> to vector<10x15x16xbf16>
    %15 = tpu.concatenate %13, %14 in 1 : vector<10x1x16xbf16>, vector<10x15x16xbf16> -> vector<10x16x16xbf16>
    %16 = vector.extract_strided_slice %12 {offsets = [0, 1, 0], sizes = [10, 15, 16], strides = [1, 1, 1]} : vector<10x16x16xbf16> to vector<10x15x16xbf16>
    %17 = tpu.concatenate %16, %13 in 1 : vector<10x15x16xbf16>, vector<10x1x16xbf16> -> vector<10x16x16xbf16>
    %18 = tpu.concatenate %15, %12, %17 in 2 : vector<10x16x16xbf16>, vector<10x16x16xbf16>, vector<10x16x16xbf16> -> vector<10x16x48xbf16>
    %cst_13 = arith.constant 0.000000e+00 : f32
    %19 = vector.broadcast %cst_13 : f32 to vector<128x8xf32>
    %20 = vector.extract_strided_slice %18 {offsets = [0, 0, 0], sizes = [8, 16, 48], strides = [1, 1, 1]} : vector<10x16x48xbf16> to vector<8x16x48xbf16>
    %21 = vector.shape_cast %20 : vector<8x16x48xbf16> to vector<128x48xbf16>
    %c0_14 = arith.constant 0 : index
    %c0_15 = arith.constant 0 : index
    %c0_16 = arith.constant 0 : index
    %22 = vector.load %arg5[%c0_14, %c0_15, %c0_16] : memref<3x48x8xbf16, #tpu.memory_space<vmem>>, vector<1x48x8xbf16>
    %23 = vector.shape_cast %22 : vector<1x48x8xbf16> to vector<48x8xbf16>
    %cst_17 = arith.constant dense<0.000000e+00> : vector<128x8xf32>
    %24 = tpu.matmul %21, %23, %cst_17 {dimension_numbers = #tpu.dot_dimension_numbers<[1], [0], [0], [1], [0, 0, 1, 1], [], []>} : vector<128x48xbf16>, vector<48x8xbf16>, vector<128x8xf32> -> vector<128x8xf32>
    %25 = arith.addf %19, %24 : vector<128x8xf32>
    %26 = vector.extract_strided_slice %18 {offsets = [1, 0, 0], sizes = [8, 16, 48], strides = [1, 1, 1]} : vector<10x16x48xbf16> to vector<8x16x48xbf16>
    %27 = vector.shape_cast %26 : vector<8x16x48xbf16> to vector<128x48xbf16>
    %c1 = arith.constant 1 : index
    %c0_18 = arith.constant 0 : index
    %c0_19 = arith.constant 0 : index
    %28 = vector.load %arg5[%c1, %c0_18, %c0_19] : memref<3x48x8xbf16, #tpu.memory_space<vmem>>, vector<1x48x8xbf16>
    %29 = vector.shape_cast %28 : vector<1x48x8xbf16> to vector<48x8xbf16>
    %cst_20 = arith.constant dense<0.000000e+00> : vector<128x8xf32>
    %30 = tpu.matmul %27, %29, %cst_20 {dimension_numbers = #tpu.dot_dimension_numbers<[1], [0], [0], [1], [0, 0, 1, 1], [], []>} : vector<128x48xbf16>, vector<48x8xbf16>, vector<128x8xf32> -> vector<128x8xf32>
    %31 = arith.addf %25, %30 : vector<128x8xf32>
    %32 = vector.extract_strided_slice %18 {offsets = [2, 0, 0], sizes = [8, 16, 48], strides = [1, 1, 1]} : vector<10x16x48xbf16> to vector<8x16x48xbf16>
    %33 = vector.shape_cast %32 : vector<8x16x48xbf16> to vector<128x48xbf16>
    %c2 = arith.constant 2 : index
    %c0_21 = arith.constant 0 : index
    %c0_22 = arith.constant 0 : index
    %34 = vector.load %arg5[%c2, %c0_21, %c0_22] : memref<3x48x8xbf16, #tpu.memory_space<vmem>>, vector<1x48x8xbf16>
    %35 = vector.shape_cast %34 : vector<1x48x8xbf16> to vector<48x8xbf16>
    %cst_23 = arith.constant dense<0.000000e+00> : vector<128x8xf32>
    %36 = tpu.matmul %33, %35, %cst_23 {dimension_numbers = #tpu.dot_dimension_numbers<[1], [0], [0], [1], [0, 0, 1, 1], [], []>} : vector<128x48xbf16>, vector<48x8xbf16>, vector<128x8xf32> -> vector<128x8xf32>
    %37 = arith.addf %31, %36 : vector<128x8xf32>
    %38 = vector.shape_cast %37 : vector<128x8xf32> to vector<8x16x8xf32>
    %c0_24 = arith.constant 0 : index
    %c0_25 = arith.constant 0 : index
    %c0_26 = arith.constant 0 : index
    %39 = vector.load %arg7[%c0_24, %c0_25, %c0_26] : memref<8x16x8xf32, #tpu.memory_space<vmem>>, vector<8x16x8xf32>
    tpu.vector_store %arg7[%c0_24, %c0_25, %c0_26], %38 {strides = array<i32>} : memref<8x16x8xf32, #tpu.memory_space<vmem>>, vector<8x16x8xf32>,
    %c0_27 = arith.constant 0 : index
    %c0_28 = arith.constant 0 : index
    %c0_29 = arith.constant 0 : index
    %40 = tpu.strided_load %arg7[%c0_27, %c0_28, %c0_29] {strides = array<i32: 2, 2, 1>} : memref<8x16x8xf32, #tpu.memory_space<vmem>>, vector<4x8x8xf32>
    %c0_30 = arith.constant 0 : index
    %c1_31 = arith.constant 1 : index
    %c0_32 = arith.constant 0 : index
    %41 = tpu.strided_load %arg7[%c0_30, %c1_31, %c0_32] {strides = array<i32: 2, 2, 1>} : memref<8x16x8xf32, #tpu.memory_space<vmem>>, vector<4x8x8xf32>
    %c1_33 = arith.constant 1 : index
    %c0_34 = arith.constant 0 : index
    %c0_35 = arith.constant 0 : index
    %42 = tpu.strided_load %arg7[%c1_33, %c0_34, %c0_35] {strides = array<i32: 2, 2, 1>} : memref<8x16x8xf32, #tpu.memory_space<vmem>>, vector<4x8x8xf32>
    %c1_36 = arith.constant 1 : index
    %c1_37 = arith.constant 1 : index
    %c0_38 = arith.constant 0 : index
    %43 = tpu.strided_load %arg7[%c1_36, %c1_37, %c0_38] {strides = array<i32: 2, 2, 1>} : memref<8x16x8xf32, #tpu.memory_space<vmem>>, vector<4x8x8xf32>
    %44 = tpu.concatenate %40, %41, %42, %43 in 2 : vector<4x8x8xf32>, vector<4x8x8xf32>, vector<4x8x8xf32>, vector<4x8x8xf32> -> vector<4x8x32xf32>
    %45 = vector.shape_cast %44 : vector<4x8x32xf32> to vector<1x4x8x32xf32>
    %c0_39 = arith.constant 0 : index
    %c0_40 = arith.constant 0 : index
    %c0_41 = arith.constant 0 : index
    %c0_42 = arith.constant 0 : index
    %46 = vector.load %arg6[%c0_39, %c0_40, %c0_41, %c0_42] : memref<1x4x8x32xf32, #tpu.memory_space<vmem>>, vector<1x4x8x32xf32>
    tpu.vector_store %arg6[%c0_39, %c0_40, %c0_41, %c0_42], %45 {strides = array<i32>} : memref<1x4x8x32xf32, #tpu.memory_space<vmem>>, vector<1x4x8x32xf32>,
    return
  }
  func.func @transform_0(%arg0: i32, %arg1: i32) -> (i32, i32, i32, i32) {
    %c8_i32 = arith.constant 8 : i32
    %0 = arith.muli %arg1, %c8_i32 : i32
    %c1_i32 = arith.constant 1 : i32
    %1 = arith.subi %0, %c1_i32 : i32
    %c0_i32 = arith.constant 0 : i32
    %2 = arith.maxsi %1, %c0_i32 : i32
    %c0_i32_0 = arith.constant 0 : i32
    %c0_i32_1 = arith.constant 0 : i32
    %c0_i32_2 = arith.constant 0 : i32
    return %arg0, %2, %c0_i32_0, %c0_i32_1 : i32, i32, i32, i32
  }
  func.func @transform_1(%arg0: i32, %arg1: i32) -> (i32, i32, i32, i32) {
    %c0_i32 = arith.constant 0 : i32
    %c0_i32_0 = arith.constant 0 : i32
    %c0_i32_1 = arith.constant 0 : i32
    return %arg0, %arg1, %c0_i32, %c0_i32_0 : i32, i32, i32, i32
  }
  func.func @transform_2(%arg0: i32, %arg1: i32) -> (i32, i32, i32, i32) {
    %c8_i32 = arith.constant 8 : i32
    %0 = arith.muli %arg1, %c8_i32 : i32
    %c8_i32_0 = arith.constant 8 : i32
    %1 = arith.addi %0, %c8_i32_0 : i32
    %c15_i32 = arith.constant 15 : i32
    %2 = arith.minsi %1, %c15_i32 : i32
    %c0_i32 = arith.constant 0 : i32
    %c0_i32_1 = arith.constant 0 : i32
    %c0_i32_2 = arith.constant 0 : i32
    return %arg0, %2, %c0_i32, %c0_i32_1 : i32, i32, i32, i32
  }
  func.func @transform_3(%arg0: i32, %arg1: i32) -> (i32, i32, i32) {
    %c0_i32 = arith.constant 0 : i32
    %c0_i32_0 = arith.constant 0 : i32
    %c0_i32_1 = arith.constant 0 : i32
    %c0_i32_2 = arith.constant 0 : i32
    return %c0_i32, %c0_i32_0, %c0_i32_1 : i32, i32, i32
  }
  func.func @transform_4(%arg0: i32, %arg1: i32) -> (i32, i32, i32, i32) {
    %c0_i32 = arith.constant 0 : i32
    %c0_i32_0 = arith.constant 0 : i32
    %c0_i32_1 = arith.constant 0 : i32
    return %arg0, %arg1, %c0_i32, %c0_i32_0 : i32, i32, i32, i32
  }
}

</mosaic_0001>

<bundles_post_ra>
// kernel: downsample_forward.1
= control target key start
LH: loop header
LB: loop body
LE: loop exit
PB: predicated region body
PF: predicated region fallthrough
CT: control target
= control target key end

     0   :  { %s1480_s15 = smov 0   ;;  %s1482_s16 = smov 0   ;;  %s1915_s0 = inlined_call_operand.vmem [shape: bf16[2,16,16,16], index: 0, kind: input, shape index: {}, may-alias: {0,1,2}]   ;;  %s1916_s1 = inlined_call_operand.vmem [shape: bf16[2,16,16,16], index: 1, kind: input, shape index: {}, may-alias: {0,1,2}]   ;;  %s1917_s2 = inlined_call_operand.vmem [shape: bf16[2,16,16,16], index: 2, kind: input, shape index: {}, may-alias: {0,1,2}]   ;;  %s1918_s3 = inlined_call_operand.vmem [shape: bf16[3,48,8], index: 3, kind: input, shape index: {}]   ;;  %s1919_s4 = inlined_call_operand.vmem [shape: f32[2,8,8,32], index: 4, kind: output, shape index: {}]  }
   0x1   :  { %s1484_s17 = smov 0   ;;  %s1486_s18 = smov 0  }
   0x2   :  { %s1488_s19 = smov 0  }
   0x3 LB: > { %s23_s20 = sadd.s32 1, %s1441_s17  ;;  %s26_s21 = sadd.s32 1, %s1445_s18  ;;  %s1449_s19 = sphi %s1488_s19, %s14_s19   ;;  %s1445_s18 = sphi %s1486_s18, %s1928_s18   ;;  %s1441_s17 = sphi %s1484_s17, %s1927_s17   ;;  %s1437_s16 = sphi %s1482_s16, %s1926_s16   ;;  %s1433_s15 = sphi %s1480_s15, %s1925_s15  }
   0x4   : > { %p24_p0 = scmp.ge.s32.totalorder %s23_s20, 2  ;;  %p1208_p1 = scmp.ge.s32.totalorder %s1449_s19, 1 }
   0x5   : > { %p248_p2 = scmp.lt.s32.totalorder %s1449_s19, 5 }
   0x6   : > { %s1930_s20 = smov (%p24_p0, %s23_s20), 0  ;;  %s1932_s21 = smov (!%p24_p0, %s26_s21), %s1445_s18 }
   0x7   : > { %p249_p3 = pnand %p1208_p1, %p248_p2  ;;  %p28_p4 = scmp.ge.s32.totalorder %s1932_s21, 2 }
   0x8   : > { %s1513_s22 = sshll.u32 (!%p249_p3), %s1433_s15, 3  ;;  %p313_p5 = scmp.lt.s32.totalorder (!%p249_p3), %s1437_s16, 1 }
   0x9   : > { %s1934_s21 = smov (%p28_p4, %s1932_s21), 0  ;;  %252 = sbr.rel (%p249_p3) target bundleno = 508 (0x1fc), region = 36 }
   0xa   : > { %p329_p6 = scmp.lt.s32.totalorder (!%p249_p3), %s1513_s22, 15  ;;  %s1210_s26 = sadd.s32 (!%p249_p3), 4294967295, %s1513_s22 }
   0xb   : > { %p311_p7 = scmp.gt.s32.totalorder (!%p249_p3), %s1210_s26, 0  ;;  %p1211_p8 = scmp.lt.s32.totalorder (!%p249_p3), %s1210_s26, 15 }
   0xc   : > { %p385_p9 = scmp.gt.s32.totalorder (!%p249_p3), %s1433_s15, 0  ;;  %s1451_s8 = smov (!%p249_p3), 16  }
   0xd   : > { %s338_s9 = sadd.s32 (!%p249_p3), 8, %s1513_s22  ;;  %p391_p11 = scmp.lt.s32.totalorder (!%p249_p3), %s1433_s15, 1 }
   0xe   : > { %s1936_s16 = smov (!%p313_p5, %s1437_s16), 1  ;;  %vm570_vm0 = vcmask 1047552   ;;  %vm571_vm1 = vsmask.f32 7424  ;;  %p1555_p10 = scmp.lt.s32.totalorder %s338_s9, 15  ;;  %v1633_v44 = vld [vmem:[%s1918_s3 + $0x40] sm:$0xff] }
   0xf   : > { %s330_s23 = scalar_select %p329_p6, %s1513_s22, 15  ;;  %vm1550_vm2 = vmand %vm570_vm0, %vm571_vm1  ;;  %883 = vmatpush.bf16.msra.mxu2 %v1633_v44  ;;  %v1709_v8 = vld [vmem:[%s1918_s3 + $0x30] sm:$0xff]  ;;  %vm527_vm5 = vcmask 1040384   ;;  %vm528_vm6 = vsmask.f32 256  ;;  %vm633_vm8 = vcmask 130048  }
  0x10   : > { %s1520_s24 = sshll.u32 %s1936_s16, 5  ;;  %s1940_s9 = smov (!%p1555_p10, %s338_s9), 15  ;;  %vm1728_vm7 = vmand %vm527_vm5, %vm528_vm6  ;;  %vm664_vm9 = vcmask 261120   ;;  %vm716_vm10 = vcmask 392192   ;;  %vm943_vm11 = vcmask 64512   ;;  %vm1047_vm12 = vcmask 195584  }
  0x11   : > { %s1220_s25 = sshll.u32 %s330_s23, 1  ;;  %s1942_s9 = smov (!%p1555_p10, %s1940_s9), 15 }
  0x12   : > { %s333_s27 = sadd.s32 %s1220_s25, %s1520_s24  ;;  %s1452_s25 = smov 32  }
  0x13   : > { %s1222_s28 = sshll.u32 %s333_s27, 2 }
  0x14   : > { %s1527_s5 = scalar_lea.vmem %s1916_s1, %s1222_s28 }
  0x15   : > { %v1531_v0 = vld [vmem:[%s1527_s5 + $0x8] sm:$0xff]  ;;  %v1534_v1 = vld [vmem:[%s1527_s5 + $0x30] sm:$0xff]  ;;  %s312_s6 = scalar_select %p311_p7, %s1210_s26, 0  ;;  %v1537_v2 = vld [vmem:[%s1527_s5] sm:$0xff] }
  0x16   : > { %s386_s7 = scalar_select %p385_p9, 1, 0  ;;  %587 = vrot.lane.b32.xlu0 %v1531_v0, %s1451_s8  ;;  %v462_v3 = vshrl.u32 %v1531_v0, 16  ;;  %v465_v4 = vshll.u32 %v1531_v0, 16  ;;  %v500_v5 = vshll.u32 %v1534_v1, 16  ;;  %585 = vrot.lane.b32.xlu2 %v1537_v2, %s1451_s8  ;;  %v497_v10 = vshrl.u32 %v1534_v1, 16 }
  0x17   : > { %s1938_s6 = smov (!%p1211_p8, %s312_s6), 15  ;;  %v458_v20 = vshll.u32 %v1537_v2, 16  ;;  %v455_v22 = vshrl.u32 %v1537_v2, 16  ;;  %v1583_v23 = vld [vmem:[%s1527_s5 + $0x38] sm:$0xff]  ;;  %v1592_v28 = vld [vmem:[%s1527_s5 + $0x10] sm:$0xff]  ;;  %s1227_s26 = sshll.u32 %s1942_s9, 1 }
  0x18   : > { %v387_v6 = vstv %s386_s7  ;;  %v544_v7 = vrot.slane %v465_v4, 1  ;;  %s1216_s10 = sshll.u32 %s1938_s6, 1  ;;  %v554_v11 = vrot.slane %v500_v5, 1  ;;  %v507_v29 = vshll.u32 %v1583_v23, 16  ;;  %s347_s27 = sadd.s32 %s1227_s26, %s1520_s24  ;;  %v1614_v37 = vld [vmem:[%s1527_s5 + $0x18] sm:$0xff]  ;;  %v1638_v46 = vld [vmem:[%s1527_s5 + $0x28] sm:$0xff] }
  0x19   : > { %s319_s11 = sadd.s32 %s1520_s24, %s1216_s10  ;;  %vm388_vm3 = vcmp.eq.s32.totalorder %v387_v6, 1  ;;  %v542_v27 = vrot.slane %v458_v20, 1  ;;  %v472_v33 = vshll.u32 %v1592_v28, 16  ;;  %v504_v34 = vshrl.u32 %v1583_v23, 16  ;;  %s1229_s24 = sshll.u32 %s347_s27, 2  ;;  %v1649_v52 = vld [vmem:[%s1527_s5 + $0x20] sm:$0xff] }
  0x1a   : > { %v545_v9 = vor.u32 %v544_v7, %v462_v3  ;;  %s1218_s13 = sshll.u32 %s319_s11, 2  ;;  %v555_v17 = vor.u32 %v554_v11, %v497_v10  ;;  %v556_v35 = vrot.slane %v507_v29, 1  ;;  %v469_v39 = vshrl.u32 %v1592_v28, 16  ;;  %s349_s6 = scalar_lea.vmem %s1917_s2, %s1229_s24 }
  0x1b   : > { %s321_s23 = scalar_lea.vmem %s1915_s0, %s1218_s13  ;;  %v543_v32 = vor.u32 %v542_v27, %v455_v22  ;;  %v546_v40 = vrot.slane %v472_v33, 1  ;;  %v479_v42 = vshll.u32 %v1614_v37, 16  ;;  %v476_v48 = vshrl.u32 %v1614_v37, 16  ;;  %v383_v50 = vld [vmem:[%s349_s6] sm:$0xf]  ;;  %v1354_v27 = vld [vmem:[%s1918_s3 + $0x28] sm:$0xff] }
  0x1c   : > { %v575_v12 = vsel %vm1550_vm2, %v545_v9, 0  ;;  %v381_v13 = vld [vmem:[%s321_s23] sm:$0xf]  ;;  %v382_v14 = vld [vmem:[%s321_s23 + $0x4] sm:$0xf]  ;;  %v580_v24 = vsel %vm1550_vm2, %v555_v17, 0  ;;  %v557_v41 = vor.u32 %v556_v35, %v504_v34  ;;  %1358 = vmatpush.bf16.msra.mxu3 %v1354_v27  ;;  %738 = vmatpush.bf16.msra.mxu0 %v1354_v27 }
  0x1d   : > { %617 = vrot.lane.b32.xlu1 %v575_v12, %s1452_s25  ;;  %v389_v15 = vsel %vm388_vm3, %v381_v13, 0  ;;  %v390_v16 = vsel %vm388_vm3, %v382_v14, 0  ;;  %s392_s28 = scalar_select %p391_p11, 1, 0  ;;  %v574_v38 = vsel %vm1550_vm2, %v543_v32, 0  ;;  %v547_v45 = vor.u32 %v546_v40, %v469_v39  ;;  %v1350_v32 = vld [vmem:[%s1918_s3 + $0x8] sm:$0xff] }
  0x1e   : > { %597 = vrot.lane.b32.xlu0 %v1534_v1, %s1451_s8  ;;  %v417_v18 = vunpack.c.l.b16 %v389_v15  ;;  %v418_v19 = vunpack.c.l.b16 %v390_v16  ;;  %v581_v47 = vsel %vm1550_vm2, %v557_v41, 0  ;;  %v548_v49 = vrot.slane %v479_v42, 1  ;;  %v384_v51 = vld [vmem:[%s349_s6 + $0x4] sm:$0xf]  ;;  %v1352_v35 = vld [vmem:[%s1918_s3 + $0x18] sm:$0xff]  ;;  %s1453_s7 = smov 8  }
  0x1f   : > { %v393_v43 = vstv %s392_s28  ;;  %v576_v53 = vsel %vm1550_vm2, %v547_v45, 0  ;;  %v493_v54 = vshll.u32 %v1638_v46, 16  ;;  %v486_v56 = vshll.u32 %v1649_v52, 16  ;;  %s1454_s9 = smov 24   ;;  %s1230_s5 = sshll.u32 %s1433_s15, 2 }
  0x20   : > { %v1577_v21 = vpack.c.b16 %v418_v19, %v417_v18  ;;  %vm394_vm4 = vcmp.eq.s32.totalorder %v393_v43, 1  ;;  %v549_v55 = vor.u32 %v548_v49, %v476_v48  ;;  %v490_v59 = vshrl.u32 %v1638_v46, 16  ;;  %p357_p12 = scmp.lt.s32.totalorder %s1230_s5, 7  ;;  %s1231_s10 = sshll.u32 %s1936_s16, 3 }
  0x21   : > { %v395_v57 = vsel %vm394_vm4, %v383_v50, 0  ;;  %v396_v58 = vsel %vm394_vm4, %v384_v51, 0  ;;  %v552_v60 = vrot.slane %v493_v54, 1  ;;  %v483_v6 = vshrl.u32 %v1649_v52, 16 }
  0x22   : > { %v448_v25 = vshrl.u32 %v1577_v21, 16  ;;  %v451_v26 = vshll.u32 %v1577_v21, 16  ;;  %583 = vrot.lane.b32.xlu2 %v1577_v21, %s1451_s8  ;;  %v435_v61 = vunpack.c.l.b16 %v395_v57  ;;  %v436_v62 = vunpack.c.l.b16 %v396_v58  ;;  %s1944_s5 = smov (!%p357_p12, %s1230_s5), 7 }
  0x23   : > { %v577_v63 = vsel %vm1550_vm2, %v549_v55, 0  ;;  %v550_v7 = vrot.slane %v486_v56, 1  ;;  %v553_v9 = vor.u32 %v552_v60, %v490_v59  ;;  %s360_s11 = sadd.s32 %s1231_s10, %s1944_s5 }
  0x24   : > { %v540_v30 = vrot.slane %v451_v26, 1  ;;  %v1672_v11 = vpack.c.b16 %v436_v62, %v435_v61  ;;  %v450_v50 = vrot.slane %v448_v25, 7  ;;  %v506_v62 = vrot.slane %v504_v34, 7  ;;  %s1232_s12 = sshll.u32 %s360_s11, 3 }
  0x25   : > { %627 = vrot.lane.b32.xlu1 %v580_v24, %s1452_s25  ;;  %v551_v12 = vor.u32 %v550_v7, %v483_v6  ;;  %v579_v13 = vsel %vm1550_vm2, %v553_v9, 0  ;;  %v1356_v24 = vld [vmem:[%s1918_s3 + $0x38] sm:$0xff]  ;;  %s362_s14 = scalar_lea.vmem %s1919_s4, %s1232_s12 }
  0x26   : > { %v541_v31 = vor.u32 %v540_v30, %v448_v25  ;;  %v514_v14 = vshll.u32 %v1672_v11, 16  ;;  %v511_v16 = vshrl.u32 %v1672_v11, 16  ;;  %v1351_v30 = vld [vmem:[%s1918_s3 + $0x10] sm:$0xff]  ;;  %884 = vmatpush.bf16.msra.mxu2 %v1356_v24  ;;  %v453_v57 = vor.u32 %v451_v26, %v450_v50 }
  0x27   : > { %v578_v15 = vsel %vm1550_vm2, %v551_v12, 0  ;;  %807 = vmatpush.bf16.msra.mxu1 %v1351_v30  ;;  %v457_v25 = vrot.slane %v455_v22, 7  ;;  %v509_v34 = vor.u32 %v507_v29, %v506_v62 }
  0x28   : > { %v573_v36 = vsel %vm1550_vm2, %v541_v31, 0  ;;  %v558_v17 = vrot.slane %v514_v14, 1  ;;  %v1353_v31 = vld [vmem:[%s1918_s3 + $0x20] sm:$0xff] }
  0x29   : > { %613 = vrot.lane.b32.xlu0 %v573_v36, %s1452_s25  ;;  %1359 = vmatpush.bf16.msra.mxu3 %v1353_v31  ;;  %v1349_v36 = vld [vmem:[%s1918_s3] sm:$0xff]  ;;  %v460_v60 = vor.u32 %v458_v20, %v457_v25 }
  0x2a   : > { %589 = vrot.lane.b32.xlu2 %v1592_v28, %s1451_s8  ;;  %v559_v18 = vor.u32 %v558_v17, %v511_v16  ;;  %885 = vmatpush.bf16.msra.mxu2 %v1709_v8 }
  0x2b   : > { %808 = vmatpush.bf16.msra.mxu1 %v1350_v32  ;;  %739 = vmatpush.bf16.msra.mxu0 %v1353_v31  ;;  %v531_v2 = vsel %vm1728_vm7, 0, %v460_v60 }
  0x2c   : > { %v582_v19 = vsel %vm1550_vm2, %v559_v18, 0  ;;  %v492_v18 = vrot.slane %v490_v59, 7 }
  0x2d   : > { %615 = vrot.lane.b32.xlu1 %v574_v38, %s1452_s25  ;;  %1360 = vmatpush.bf16.msra.mxu3 %v1352_v35  ;;  %v464_v38 = vrot.slane %v462_v3, 7 }
  0x2f   : > { %809 = vmatpush.bf16.msra.mxu1 %v1349_v36  ;;  %740 = vmatpush.bf16.msra.mxu0 %v1352_v35  ;;  %v467_v41 = vor.u32 %v465_v4, %v464_v38 }
  0x31   : > { %599 = vrot.lane.b32.xlu0 %v1583_v23, %s1451_s8  ;;  %1361 = vmatpush.bf16.msrb.mxu3 %v1351_v30  ;;  %v532_v49 = vsel %vm1728_vm7, 0, %v467_v41  ;;  %v495_v30 = vor.u32 %v493_v54, %v492_v18 }
  0x32   : > { %629 = vrot.lane.b32.xlu2 %v581_v47, %s1452_s25  ;;  %v499_v47 = vrot.slane %v497_v10, 7 }
  0x33   : > { %v536_v59 = vsel %vm1728_vm7, 0, %v495_v30 }
  0x34   : > { %v502_v0 = vor.u32 %v500_v5, %v499_v47  ;;  %v530_v5 = vsel %vm1728_vm7, 0, %v453_v57 }
  0x35   : > { %619 = vrot.lane.b32.xlu1 %v576_v53, %s1452_s25  ;;  %1362 = vmatpush.bf16.msrb.mxu3 %v1350_v32 }
  0x36   : > { %v537_v10 = vsel %vm1728_vm7, 0, %v502_v0 }
  0x39   : > { %591 = vrot.lane.b32.xlu0 %v1614_v37, %s1451_s8  ;;  %1363 = vmatpush.bf16.msrb.mxu3 %v1349_v36  ;;  %v485_v37 = vrot.slane %v483_v6, 7 }
  0x3a   : > { %621 = vrot.lane.b32.xlu2 %v577_v63, %s1452_s25  ;;  %v471_v63 = vrot.slane %v469_v39, 7  ;;  %v538_v39 = vsel %vm1728_vm7, 0, %v509_v34 }
  0x3b   : > { %v488_v38 = vor.u32 %v486_v56, %v485_v37 }
  0x3d   : > { %595 = vrot.lane.b32.xlu1 %v1638_v46, %s1451_s8 }
  0x41   : > { %625 = vrot.lane.b32.xlu0 %v579_v13, %s1452_s25 }
  0x42   : > { %623 = vrot.lane.b32.xlu2 %v578_v15, %s1452_s25 }
  0x45   : > { %593 = vrot.lane.b32.xlu1 %v1649_v52, %s1451_s8  ;;  %v513_v52 = vrot.slane %v511_v16, 7 }
  0x47   : > { %v516_v56 = vor.u32 %v514_v14, %v513_v52 }
  0x49   : > { %601 = vrot.lane.b32.xlu0 %v1672_v11, %s1451_s8 }
  0x4d   : > { %631 = vrot.lane.b32.xlu1 %v582_v19, %s1452_s25 }
  0x70   : > { %v586_v40 = vpop.permute.xlu2 %585 }
  0x71   : > { %v639_v7 = vsel %vm633_vm8, %v531_v2, %v586_v40  ;;  %v535_v40 = vsel %vm1728_vm7, 0, %v488_v38 }
  0x7c   : > { %v584_v51 = vpop.permute.xlu2 %583 }
  0x7d   : > { %v636_v21 = vsel %vm633_vm8, %v530_v5, %v584_v51 }
  0x84   : > { %v590_v22 = vpop.permute.xlu2 %589 }
  0x88   : > { %v588_v45 = vpop.permute.xlu0 %587 }
  0x89   : > { %v642_v3 = vsel %vm633_vm8, %v532_v49, %v588_v45  ;;  %v539_v49 = vsel %vm1728_vm7, 0, %v516_v56 }
  0x8c   : > { %v630_v15 = vpop.permute.xlu2 %629 }
  0x8f   : > { %v618_v4 = vpop.permute.xlu1 %617 }
  0x90   : > { %v670_v53 = vsel %vm664_vm9, %v642_v3, %v618_v4  ;;  %v598_v55 = vpop.permute.xlu0 %597 }
  0x91   : > { %1329 = vmatmul.msk.bf16.vlgmr.msra.gmra.mxu2 %vm716_vm10, %v670_v53  ;;  %v657_v1 = vsel %vm633_vm8, %v537_v10, %v598_v55 }
  0x94   : > { %v622_v54 = vpop.permute.xlu2 %621 }
  0x97   : > { %v628_v58 = vpop.permute.xlu1 %627 }
  0x98   : > { %v1755_v61 = vsel %vm664_vm9, %v657_v1, %v628_v58 }
  0x99   : > { %1289 = vmatmul.msk.bf16.vlgmr.msra.gmra.mxu3 %vm716_vm10, %v1755_v61 }
  0x9a   : > { %1364 = vmatpush.bf16.msra.mxu3 %v1633_v44  ;;  %v474_v44 = vor.u32 %v472_v33, %v471_v63 }
  0x9b   : > { %v614_v26 = vpop.permute.xlu0 %613 }
  0x9c   : > { %v666_v20 = vsel %vm664_vm9, %v636_v21, %v614_v26  ;;  %v533_v23 = vsel %vm1728_vm7, 0, %v474_v44  ;;  %v624_v6 = vpop.permute.xlu2 %623 }
  0x9d   : > { %1303 = vmatmul.msk.bf16.vlgmr.msra.gmra.mxu1 %vm716_vm10, %v666_v20  ;;  %v645_v28 = vsel %vm633_vm8, %v533_v23, %v590_v22 }
  0x9e   : > { %1365 = vmatpush.bf16.msra.mxu3 %v1356_v24  ;;  %v478_v24 = vrot.slane %v476_v48, 7 }
  0x9f   : > { %v616_v9 = vpop.permute.xlu1 %615 }
  0xa0   : > { %v668_v12 = vsel %vm664_vm9, %v639_v7, %v616_v9 }
  0xa1   : > { %1283 = vmatmul.msk.bf16.vlgmr.msra.gmra.mxu0 %vm716_vm10, %v668_v12 }
  0xa2   : > { %1366 = vmatpush.bf16.msra.mxu3 %v1709_v8  ;;  %v481_v8 = vor.u32 %v479_v42, %v478_v24 }
  0xa3   : > { %v600_v13 = vpop.permute.xlu0 %599 }
  0xa4   : > { %v660_v29 = vsel %vm633_vm8, %v538_v39, %v600_v13  ;;  %v534_v32 = vsel %vm1728_vm7, 0, %v481_v8 }
  0xa5   : > { %v682_v17 = vsel %vm664_vm9, %v660_v29, %v630_v15 }
  0xa7   : > { %v620_v33 = vpop.permute.xlu1 %619 }
  0xa8   : > { %v672_v19 = vsel %vm664_vm9, %v645_v28, %v620_v33 }
  0xa9   : > { %1290 = vmatmul.msk.bf16.gmra.mxu3 %vm716_vm10, %v682_v17  ;;  %1330 = vmatmul.msk.bf16.gmra.mxu2 %vm716_vm10, %v672_v19 }
  0xab   : > { %v592_v27 = vpop.permute.xlu0 %591 }
  0xac   : > { %v648_v46 = vsel %vm633_vm8, %v534_v32, %v592_v27 }
  0xad   : > { %1304 = vmatmul.msk.bf16.gmra.mxu1 %vm716_vm10, %v668_v12  ;;  %v674_v42 = vsel %vm664_vm9, %v648_v46, %v622_v54 }
  0xaf   : > { %v596_v31 = vpop.permute.xlu1 %595 }
  0xb0   : > { %v654_v48 = vsel %vm633_vm8, %v536_v59, %v596_v31 }
  0xb1   : > { %1284 = vmatmul.msk.bf16.gmra.mxu0 %vm716_vm10, %v670_v53 }
  0xb3   : > { %v626_v35 = vpop.permute.xlu0 %625 }
  0xb4   : > { %v678_v36 = vsel %vm664_vm9, %v654_v48, %v626_v35 }
  0xb7   : > { %v594_v41 = vpop.permute.xlu1 %593 }
  0xb8   : > { %v651_v45 = vsel %vm633_vm8, %v535_v40, %v594_v41 }
  0xb9   : > { %1309 = vmatmul.msk.bf16.vlgmr.msrb.gmra.mxu3 %vm716_vm10, %v678_v36  ;;  %1331 = vmatmul.msk.bf16.gmra.mxu2 %vm716_vm10, %v674_v42  ;;  %v676_v47 = vsel %vm664_vm9, %v651_v45, %v624_v6 }
  0xbb   : > { %v602_v3 = vpop.permute.xlu0 %601 }
  0xbc   : > { %v663_v50 = vsel %vm633_vm8, %v539_v49, %v602_v3 }
  0xbd   : > { %1305 = vmatmul.msk.bf16.gmra.mxu1 %vm716_vm10, %v670_v53 }
  0xbf   : > { %v632_v0 = vpop.permute.xlu1 %631 }
  0xc0   : > { %v684_v16 = vsel %vm664_vm9, %v663_v50, %v632_v0 }
  0xc1   : > { %1285 = vmatmul.msk.bf16.gmra.mxu0 %vm716_vm10, %v672_v19 }
  0xc9   : > { %1310 = vmatmul.msk.bf16.gmra.mxu3 %vm716_vm10, %v1755_v61  ;;  %1332 = vmatmul.msk.bf16.gmra.mxu2 %vm716_vm10, %v676_v47 }
  0xcd   : > { %1306 = vmatmul.msk.bf16.gmra.mxu1 %vm716_vm10, %v672_v19 }
  0xd1   : > { %1286 = vmatmul.msk.bf16.gmra.mxu0 %vm716_vm10, %v674_v42 }
  0xd9   : > { %1333 = vmatmul.msk.bf16.gmra.mxu2 %vm716_vm10, %v678_v36  ;;  %1335 = vmatmul.msk.bf16.vlgmr.msra.gmra.mxu3 %vm716_vm10, %v682_v17 }
  0xdd   : > { %1307 = vmatmul.msk.bf16.gmra.mxu1 %vm716_vm10, %v674_v42 }
  0xe1   : > { %1287 = vmatmul.msk.bf16.gmra.mxu0 %vm716_vm10, %v676_v47 }
  0xe9   : > { %1334 = vmatmul.msk.bf16.gmra.mxu2 %vm716_vm10, %v1755_v61  ;;  %1336 = vmatmul.msk.bf16.gmra.mxu3 %vm716_vm10, %v684_v16 }
  0xed   : > { %1308 = vmatmul.msk.bf16.gmra.mxu1 %vm716_vm10, %v676_v47 }
  0xf1   : > { %1288 = vmatmul.msk.bf16.gmra.mxu0 %vm716_vm10, %v678_v36 }
 0x114   : > { %v887_v11 = vpop.f32.mrf.mxu2 }
 0x11a   : > { %v811_v14 = vpop.f32.mrf.mxu1 }
 0x11c   : > { %v1839_v43 = vpop.f32.mrf.mxu3  ;;  %v889_v10 = vpop.f32.mrf.mxu2 }
 0x11e   : > { %v742_v4 = vpop.f32.mrf.mxu0 }
 0x11f   : > { %v812_v51 = vadd.f32 %v811_v14, %v742_v4 }
 0x121   : > { %v927_v53 = vadd.f32 %v887_v11, %v812_v51 }
 0x122   : > { %v813_v55 = vpop.f32.mrf.mxu1 }
 0x123   : > { %944 = vst.msk [vmem:[#allocation2] sm:$0xff] %vm943_vm11, %v927_v53 }
 0x124   : > { %v1842_v57 = vpop.f32.mrf.mxu3 }
 0x126   : > { %v744_v25 = vpop.f32.mrf.mxu0 }
 0x127   : > { %v814_v1 = vadd.f32 %v813_v55, %v744_v25 }
 0x129   : > { %v928_v5 = vadd.f32 %v889_v10, %v814_v1 }
 0x12a   : > { %v816_v58 = vpop.f32.mrf.mxu1 }
 0x12b   : > { %945 = vst.msk [vmem:[#allocation2 + $0x8] sm:$0xff] %vm943_vm11, %v928_v5 }
 0x12c   : > { %v1845_v60 = vpop.f32.mrf.mxu3  ;;  %v892_v61 = vpop.f32.mrf.mxu2 }
 0x12e   : > { %v747_v62 = vpop.f32.mrf.mxu0 }
 0x12f   : > { %v817_v21 = vadd.f32 %v816_v58, %v747_v62 }
 0x131   : > { %v929_v22 = vadd.f32 %v892_v61, %v817_v21 }
 0x132   : > { %v818_v26 = vpop.f32.mrf.mxu1  ;;  %v968_v63 = vld [vmem:[#allocation2 + $0x1] ss:$2 sm:$0xff] }
 0x133   : > { %946 = vst.msk [vmem:[#allocation2 + $0x10] sm:$0xff] %vm943_vm11, %v929_v22  ;;  %995 = vrot.lane.b32.xlu2 %v968_v63, %s1453_s7 }
 0x134   : > { %v1849_v2 = vpop.f32.mrf.mxu3  ;;  %v894_v20 = vpop.f32.mrf.mxu2 }
 0x136   : > { %v749_v34 = vpop.f32.mrf.mxu0 }
 0x137   : > { %v819_v7 = vadd.f32 %v818_v26, %v749_v34 }
 0x139   : > { %v930_v9 = vadd.f32 %v894_v20, %v819_v7 }
 0x13a   : > { %v821_v44 = vpop.f32.mrf.mxu1 }
 0x13b   : > { %947 = vst.msk [vmem:[#allocation2 + $0x18] sm:$0xff] %vm943_vm11, %v930_v9 }
 0x13c   : > { %v841_v12 = vpop.f32.mrf.mxu3  ;;  %v897_v39 = vpop.f32.mrf.mxu2 }
 0x13d   : > { %v842_v41 = vadd.f32 %v841_v12, %v1839_v43 }
 0x13e   : > { %v752_v13 = vpop.f32.mrf.mxu0 }
 0x13f   : > { %v822_v15 = vadd.f32 %v821_v44, %v752_v13 }
 0x141   : > { %v931_v23 = vadd.f32 %v897_v39, %v822_v15  ;;  %v960_v15 = vld [vmem:[#allocation2] ss:$2 sm:$0xff] }
 0x142   : > { %v823_v29 = vpop.f32.mrf.mxu1  ;;  %v984_v17 = vld [vmem:[#allocation2 + $0x11] ss:$2 sm:$0xff]  ;;  %v976_v28 = vld [vmem:[#allocation2 + $0x10] ss:$2 sm:$0xff] }
 0x143   : > { %948 = vst.msk [vmem:[#allocation2 + $0x20] sm:$0xff] %vm943_vm11, %v931_v23  ;;  %1027 = vrot.lane.b32.xlu1 %v984_v17, %s1454_s9  ;;  %1011 = vrot.lane.b32.xlu0 %v976_v28, %s1451_s8 }
 0x144   : > { %v843_v33 = vpop.f32.mrf.mxu3  ;;  %v899_v18 = vpop.f32.mrf.mxu2 }
 0x145   : > { %v844_v0 = vadd.f32 %v843_v33, %v1842_v57 }
 0x146   : > { %v754_v19 = vpop.f32.mrf.mxu0 }
 0x147   : > { %v824_v24 = vadd.f32 %v823_v29, %v754_v19 }
 0x149   : > { %v932_v27 = vadd.f32 %v899_v18, %v824_v24 }
 0x14a   : > { %v826_v30 = vpop.f32.mrf.mxu1 }
 0x14b   : > { %949 = vst.msk [vmem:[#allocation2 + $0x28] sm:$0xff] %vm943_vm11, %v932_v27 }
 0x14c   : > { %v846_v8 = vpop.f32.mrf.mxu3  ;;  %v902_v59 = vpop.f32.mrf.mxu2 }
 0x14d   : > { %v847_v53 = vadd.f32 %v846_v8, %v1845_v60 }
 0x14e   : > { %v757_v31 = vpop.f32.mrf.mxu0 }
 0x14f   : > { %v827_v32 = vadd.f32 %v826_v30, %v757_v31 }
 0x151   : > { %v933_v48 = vadd.f32 %v902_v59, %v827_v32 }
 0x152   : > { %v828_v35 = vpop.f32.mrf.mxu1  ;;  %v970_v46 = vld [vmem:[#allocation2 + $0x21] ss:$2 sm:$0xff]  ;;  %v962_v30 = vld [vmem:[#allocation2 + $0x20] ss:$2 sm:$0xff] }
 0x153   : > { %950 = vst.msk [vmem:[#allocation2 + $0x30] sm:$0xff] %vm943_vm11, %v933_v48  ;;  %997 = vrot.lane.b32.xlu0 %v970_v46, %s1453_s7 }
 0x154   : > { %v848_v54 = vpop.f32.mrf.mxu3  ;;  %v904_v36 = vpop.f32.mrf.mxu2 }
 0x155   : > { %v849_v21 = vadd.f32 %v848_v54, %v1849_v2 }
 0x156   : > { %v759_v37 = vpop.f32.mrf.mxu0 }
 0x157   : > { %v829_v42 = vadd.f32 %v828_v35, %v759_v37 }
 0x159   : > { %v934_v38 = vadd.f32 %v904_v36, %v829_v42 }
 0x15a   : > { %v831_v40 = vpop.f32.mrf.mxu1 }
 0x15b   : > { %951 = vst.msk [vmem:[#allocation2 + $0x38] sm:$0xff] %vm943_vm11, %v934_v38 }
 0x15c   : > { %v907_v45 = vpop.f32.mrf.mxu2  ;;  %v917_v6 = vpop.f32.mrf.mxu3 }
 0x15d   : > { %v939_v47 = vadd.f32 %v917_v6, %v842_v41 }
 0x15e   : > { %v762_v52 = vpop.f32.mrf.mxu0 }
 0x15f   : > { %956 = vst.msk [vmem:[#allocation2 + $0x60] sm:$0xff] %vm943_vm11, %v939_v47  ;;  %v832_v56 = vadd.f32 %v831_v40, %v762_v52 }
 0x161   : > { %v935_v49 = vadd.f32 %v907_v45, %v832_v56 }
 0x162   : > { %v833_v3 = vpop.f32.mrf.mxu1  ;;  %v978_v50 = vld [vmem:[#allocation2 + $0x30] ss:$2 sm:$0xff]  ;;  %v986_v39 = vld [vmem:[#allocation2 + $0x31] ss:$2 sm:$0xff] }
 0x163   : > { %952 = vst.msk [vmem:[#allocation2 + $0x40] sm:$0xff] %vm943_vm11, %v935_v49  ;;  %1013 = vrot.lane.b32.xlu1 %v978_v50, %s1451_s8 }
 0x164   : > { %v909_v16 = vpop.f32.mrf.mxu2  ;;  %v919_v11 = vpop.f32.mrf.mxu3 }
 0x165   : > { %v940_v14 = vadd.f32 %v919_v11, %v844_v0 }
 0x166   : > { %v764_v43 = vpop.f32.mrf.mxu0 }
 0x167   : > { %957 = vst.msk [vmem:[#allocation2 + $0x68] sm:$0xff] %vm943_vm11, %v940_v14  ;;  %v834_v4 = vadd.f32 %v833_v3, %v764_v43 }
 0x169   : > { %v936_v51 = vadd.f32 %v909_v16, %v834_v4 }
 0x16a   : > { %v836_v55 = vpop.f32.mrf.mxu1 }
 0x16b   : > { %953 = vst.msk [vmem:[#allocation2 + $0x48] sm:$0xff] %vm943_vm11, %v936_v51 }
 0x16c   : > { %v922_v10 = vpop.f32.mrf.mxu3  ;;  %v912_v57 = vpop.f32.mrf.mxu2 }
 0x16d   : > { %v941_v25 = vadd.f32 %v922_v10, %v847_v53 }
 0x16e   : > { %v767_v1 = vpop.f32.mrf.mxu0  ;;  %v974_v5 = vld [vmem:[#allocation2 + $0x61] ss:$2 sm:$0xff]  ;;  %v966_v35 = vld [vmem:[#allocation2 + $0x60] ss:$2 sm:$0xff] }
 0x16f   : > { %958 = vst.msk [vmem:[#allocation2 + $0x70] sm:$0xff] %vm943_vm11, %v941_v25  ;;  %v837_v58 = vadd.f32 %v836_v55, %v767_v1  ;;  %1001 = vrot.lane.b32.xlu2 %v974_v5, %s1453_s7 }
 0x171   : > { %v937_v61 = vadd.f32 %v912_v57, %v837_v58 }
 0x172   : > { %v972_v62 = vld [vmem:[#allocation2 + $0x41] ss:$2 sm:$0xff]  ;;  %v838_v26 = vpop.f32.mrf.mxu1  ;;  %v964_v38 = vld [vmem:[#allocation2 + $0x40] ss:$2 sm:$0xff] }
 0x173   : > { %954 = vst.msk [vmem:[#allocation2 + $0x50] sm:$0xff] %vm943_vm11, %v937_v61  ;;  %999 = vrot.lane.b32.xlu1 %v972_v62, %s1453_s7 }
 0x174   : > { %v924_v60 = vpop.f32.mrf.mxu3  ;;  %v914_v34 = vpop.f32.mrf.mxu2 }
 0x175   : > { %v942_v22 = vadd.f32 %v924_v60, %v849_v21 }
 0x176   : > { %v769_v63 = vpop.f32.mrf.mxu0 }
 0x177   : > { %959 = vst.msk [vmem:[#allocation2 + $0x78] sm:$0xff] %vm943_vm11, %v942_v22  ;;  %v839_v20 = vadd.f32 %v838_v26, %v769_v63 }
 0x179   : > { %v938_v7 = vadd.f32 %v914_v34, %v839_v20 }
 0x17b   : > { %955 = vst.msk [vmem:[#allocation2 + $0x58] sm:$0xff] %vm943_vm11, %v938_v7 }
 0x17e   : > { %v990_v9 = vld [vmem:[#allocation2 + $0x71] ss:$2 sm:$0xff]  ;;  %v982_v44 = vld [vmem:[#allocation2 + $0x70] ss:$2 sm:$0xff] }
 0x17f   : > { %1033 = vrot.lane.b32.xlu1 %v990_v9, %s1454_s9  ;;  %1017 = vrot.lane.b32.xlu0 %v982_v44, %s1451_s8 }
 0x182   : > { %v980_v2 = vld [vmem:[#allocation2 + $0x50] ss:$2 sm:$0xff]  ;;  %v988_v12 = vld [vmem:[#allocation2 + $0x51] ss:$2 sm:$0xff] }
 0x183   : > { %1015 = vrot.lane.b32.xlu2 %v980_v2, %s1451_s8 }
 0x187   : > { %1031 = vrot.lane.b32.xlu0 %v988_v12, %s1454_s9 }
 0x18b   : > { %1029 = vrot.lane.b32.xlu2 %v986_v39, %s1454_s9 }
 0x18d   : > { %v996_v13 = vpop.permute.xlu2 %995 }
 0x18e   : > { %v1039_v23 = vsel %vm943_vm11, %v960_v15, %v996_v13 }
 0x1b5   : > { %v1028_v29 = vpop.permute.xlu1 %1027  ;;  %v1012_v17 = vpop.permute.xlu0 %1011 }
 0x1b6   : > { %v1043_v28 = vsel %vm633_vm8, %v1039_v23, %v1012_v17 }
 0x1b7   : > { %v1048_v33 = vsel %vm1047_vm12, %v1043_v28, %v1028_v29 }
 0x1b8   : > { %1052 = vst.msk [vmem:[%s362_s14] sm:$0xff] %vm664_vm9, %v1048_v33 }
 0x1c5   : > { %v998_v24 = vpop.permute.xlu0 %997 }
 0x1c6   : > { %v1040_v8 = vsel %vm943_vm11, %v962_v30, %v998_v24 }
 0x1c9   : > { %v1002_v18 = vpop.permute.xlu2 %1001 }
 0x1ca   : > { %v1042_v46 = vsel %vm943_vm11, %v966_v35, %v1002_v18 }
 0x1d5   : > { %v1014_v27 = vpop.permute.xlu1 %1013 }
 0x1d6   : > { %v1044_v59 = vsel %vm633_vm8, %v1040_v8, %v1014_v27 }
 0x1dd   : > { %v1016_v19 = vpop.permute.xlu2 %1015 }
 0x1e5   : > { %v1030_v31 = vpop.permute.xlu2 %1029  ;;  %v1000_v48 = vpop.permute.xlu1 %999 }
 0x1e6   : > { %v1049_v32 = vsel %vm1047_vm12, %v1044_v59, %v1030_v31  ;;  %v1041_v40 = vsel %vm943_vm11, %v964_v38, %v1000_v48 }
 0x1e7   : > { %1053 = vst.msk [vmem:[%s362_s14 + $0x8] sm:$0xff] %vm664_vm9, %v1049_v32  ;;  %v1045_v45 = vsel %vm633_vm8, %v1041_v40, %v1016_v19 }
 0x1f1   : > { %v1034_v54 = vpop.permute.xlu1 %1033  ;;  %v1018_v36 = vpop.permute.xlu0 %1017 }
 0x1f2   : > { %v1046_v37 = vsel %vm633_vm8, %v1042_v46, %v1018_v36 }
 0x1f3   : > { %v1051_v42 = vsel %vm1047_vm12, %v1046_v37, %v1034_v54 }
 0x1f4   : > { %1055 = vst.msk [vmem:[%s362_s14 + $0x18] sm:$0xff] %vm664_vm9, %v1051_v42 }
 0x1f9   : > { %v1032_v41 = vpop.permute.xlu0 %1031 }
 0x1fa   : > { %v1050_v6 = vsel %vm1047_vm12, %v1045_v45, %v1032_v41 }
 0x1fb   : > { %1054 = vst.msk [vmem:[%s362_s14 + $0x10] sm:$0xff] %vm664_vm9, %v1050_v6 }
 0x1fc PF: > { %s14_s19 = sadd.s32 1, %s1449_s19   ;;  %s1925_s15 = smov %s1441_s17 }
 0x1fd   : > { %p11_p13 = scmp.ge.s32.totalorder %s14_s19, 6   ;;  %s1926_s16 = smov %s1445_s18 }
 0x1fe   : > { %s1927_s17 = smov %s1930_s20  ;;  %s1928_s18 = smov %s1934_s21 }
 0x1ff   :  { %13 = sbr.rel (!%p11_p13) target bundleno = 3 (0x3), region = 89 }

</bundles_post_ra>
